<compile_context>
chip_gen: v5e
topology: v5e:2x2
jax: 0.10.0
libtpu: 0.0.40
codegen_flags: <defaults>
</compile_context>

<pallas_src>
import functools

import jax
import jax.numpy as jnp
from jax.experimental import pallas as pl
from jax.experimental.pallas import tpu as pltpu


class Config:
    category_num = 16
    embedding_dim = 32
    dropout = 0.2


def _round_up(x: int, m: int) -> int:
    return (x + m - 1) // m * m


def prepare_table(table, *, lane_width: int = 128, dtype=jnp.bfloat16):
    """One-time weight relayout (do this next to the weights, NOT per forward call).

    Returns a (group, v_pad, lane_w) array: band g holds the vocab-padded table in
    lane slots [g*D, (g+1)*D) and zeros elsewhere, so `group` D-wide lookups pack
    side-by-side into one lane-dense output row and the sum of the per-group MXU
    matmuls is already the packed row (no in-kernel relayout, full-width stores).
    Use lane_width=256 on v6e/v7x to fill the 256-wide MXU; keep 128 on v5e.
    """
    V, D = table.shape
    group = lane_width // D if (D <= lane_width and lane_width % D == 0) else 1
    lane_w = group * D
    v_pad = _round_up(max(V, 1), 128)
    t = table.astype(dtype)
    bands = jnp.zeros((group, v_pad, lane_w), dtype)
    for g in range(group):
        bands = bands.at[g, :V, g * D:(g + 1) * D].set(t)
    return bands


def _make_kernel(*, group: int, v_pad: int, lane_w: int, apply_dropout: bool,
                 keep_threshold: int):
    def kernel(*refs):
        if apply_dropout:
            ids_ref, table_ref, bits_ref, out_ref = refs
        else:
            ids_ref, table_ref, out_ref = refs

        ids = ids_ref[...]                                   # (rows, group) int32
        rows = ids.shape[0]

        # One K=128 one-hot per packed lookup.  For in-range ids this is an exact
        # 0/1 matrix; out-of-range ids (torch would raise) simply produce zeros.
        kcol = jax.lax.broadcasted_iota(jnp.int32, (rows, v_pad), 1)
        acc = None
        for g in range(group):
            onehot = (kcol == ids[:, g:g + 1]).astype(table_ref.dtype)  # bf16, exact
            part = jnp.dot(onehot, table_ref[g],
                           preferred_element_type=jnp.float32)          # MXU, f32 acc
            acc = part if acc is None else acc + part        # disjoint lane bands

        act = jnp.maximum(acc, 0.0)                          # ReLU in f32 (v5e-safe)

        if apply_dropout:
            keep = bits_ref[...] < jnp.uint32(keep_threshold)
            act = jnp.where(keep, act, 0.0)                  # 1/keep folded into table

        out_ref[...] = act.astype(out_ref.dtype)             # lane-dense bf16 store

    return kernel


@functools.partial(jax.jit,
                   static_argnames=("embedding_dim", "dropout_p", "training",
                                    "tile_rows"))
def category_encoder_forward(categories, table_bands, rng_key=None, *,
                             embedding_dim: int, dropout_p: float = 0.0,
                             training: bool = False, tile_rows: int = 2048):
    B, N = categories.shape
    group, v_pad, lane_w = table_bands.shape
    D = int(embedding_dim)
    assert lane_w == group * D, "table_bands layout does not match embedding_dim"
    T = B * N
    apply_dropout = bool(training) and float(dropout_p) > 0.0

    # --- tiling of the flattened lookup axis -------------------------------------
    unit = group * 8                       # keeps second-minor block dims % 8 == 0
    T_req = _round_up(max(T, 1), unit)
    tile_t = min(_round_up(int(tile_rows), unit), T_req)
    # Make sure the "parallel" grid has >= 2 steps when there is enough work, so
    # both v7x TensorCores get a tile (no effect on single-TC v5e/v6e correctness).
    if T_req // tile_t < 2 and T_req >= 2 * unit:
        tile_t = _round_up(T_req // 2, unit)
    t_pad = _round_up(T_req, tile_t)
    rows_per_tile = tile_t // group
    n_rows = t_pad // group
    grid = (t_pad // tile_t,)

    # ids: flatten, pad with 0 (padding_idx row -> zero embedding), lane-group.
    ids = categories.reshape(-1).astype(jnp.int32)
    ids = jnp.pad(ids, (0, t_pad - T))
    ids2d = ids.reshape(n_rows, group)

    # --- dropout prep --------------------------------------------------------------
    table_in = table_bands
    thresh = 0
    inputs_extra = []
    if apply_dropout:
        keep_prob = 1.0 - float(dropout_p)
        # Fold 1/keep into the tiny table (ReLU commutes with a positive scale) so
        # the kernel's dropout is a bare select-to-zero, no per-element multiply.
        table_in = (table_bands.astype(jnp.float32) *
                    (1.0 / keep_prob)).astype(table_bands.dtype)
        thresh = min(int(keep_prob * 4294967296.0), 4294967295)
        if rng_key is None:
            raise ValueError("training with dropout requires rng_key")
        # TODO(synk): replace with in-kernel pltpu.prng_seed/prng_random_bits on real
        # TPUs; drawn host-side here because the interpret/CPU fallback cannot lower
        # the TPU PRNG primitives.
        bits = jax.random.bits(rng_key, (n_rows, lane_w), dtype=jnp.uint32)
        inputs_extra = [bits]

    kernel = _make_kernel(group=group, v_pad=v_pad, lane_w=lane_w,
                          apply_dropout=apply_dropout, keep_threshold=thresh)

    in_specs = [
        pl.BlockSpec((rows_per_tile, group), lambda i: (i, 0)),          # ids
        # Grid-invariant table block (group*v_pad*lane_w, tiny at these V).
        pl.BlockSpec((group, v_pad, lane_w), lambda i: (0, 0, 0)),       # table
    ]
    if apply_dropout:
        in_specs.append(pl.BlockSpec((rows_per_tile, lane_w), lambda i: (i, 0)))

    out = pl.pallas_call(
        kernel,
        out_shape=jax.ShapeDtypeStruct((n_rows, lane_w), table_bands.dtype),
        grid_spec=pltpu.PrefetchScalarGridSpec(
            num_scalar_prefetch=0,
            grid=grid,
            in_specs=in_specs,
            out_specs=pl.BlockSpec((rows_per_tile, lane_w), lambda i: (i, 0)),
        ),
        compiler_params=pltpu.CompilerParams(
            dimension_semantics=("parallel",)),              # megacore over T tiles
    )(ids2d, table_in, *inputs_extra)

    # (n_rows, group*D) is row-major identical to (t_pad, D): free relayout outside.
    return out.reshape(t_pad, D)[:T].reshape(B, N, D)


if __name__ == "__main__":
    cfg = Config()
    key = jax.random.PRNGKey(0)
    k_tab, k_ids, k_ids2, k_drop = jax.random.split(key, 4)

    # nn.Embedding(category_num, embedding_dim, padding_idx=0): row 0 zeroed.
    table = jax.random.normal(k_tab, (cfg.category_num, cfg.embedding_dim),
                              dtype=jnp.float32)
    table = table.at[0].set(0.0)

    # One-time weight relayouts (128-lane for v5e, 256-lane variant for v6e/v7x MXU).
    table_bd = prepare_table(table, lane_width=128)
    table_bd_256 = prepare_table(table, lane_width=256)

    # Reference uses the bf16-rounded weights (the one-hot/MXU path is otherwise exact).
    table_ref_f32 = table.astype(jnp.bfloat16).astype(jnp.float32)

    # --- small shape consistent with the module: batch=2, num_categories=8 --------
    B, N = 2, 8
    categories = jax.random.randint(k_ids, (B, N), 0, cfg.category_num,
                                    dtype=jnp.int32)
    out = jax.block_until_ready(
        category_encoder_forward(categories, table_bd,
                                 embedding_dim=cfg.embedding_dim,
                                 dropout_p=cfg.dropout, training=False))
    ref = jnp.maximum(jnp.take(table_ref_f32, categories, axis=0), 0.0)
    assert out.shape == (B, N, cfg.embedding_dim)
    assert jnp.allclose(out.astype(jnp.float32), ref, atol=1e-5), \
        "eval-mode mismatch vs reference"

    # --- larger batch exercising the multi-tile "parallel" grid path --------------
    B2, N2 = 64, 16
    cats2 = jax.random.randint(k_ids2, (B2, N2), 0, cfg.category_num,
                               dtype=jnp.int32)
    ref2 = jnp.maximum(jnp.take(table_ref_f32, cats2, axis=0), 0.0)
    out2 = jax.block_until_ready(
        category_encoder_forward(cats2, table_bd,
                                 embedding_dim=cfg.embedding_dim,
                                 dropout_p=cfg.dropout, training=False))
    assert jnp.allclose(out2.astype(jnp.float32), ref2, atol=1e-5), \
        "tiled eval-mode mismatch"

    # --- 256-lane packing variant (fills the 256-wide v6e/v7x MXU) ----------------
    out3 = jax.block_until_ready(
        category_encoder_forward(cats2, table_bd_256,
                                 embedding_dim=cfg.embedding_dim,
                                 dropout_p=cfg.dropout, training=False))
    assert jnp.allclose(out3.astype(jnp.float32), ref2, atol=1e-5), \
        "256-lane packing mismatch"

    # --- training mode: every element must be 0 or ref * 1/(1-p) (RNG != torch) ---
    scale = 1.0 / (1.0 - cfg.dropout)
    table_scaled_f32 = (table.astype(jnp.bfloat16).astype(jnp.float32) *
                        scale).astype(jnp.bfloat16).astype(jnp.float32)
    ref_tr = jnp.maximum(jnp.take(table_scaled_f32, cats2, axis=0), 0.0)
    out_tr = jax.block_until_ready(
        category_encoder_forward(cats2, table_bd, rng_key=k_drop,
                                 embedding_dim=cfg.embedding_dim,
                                 dropout_p=cfg.dropout, training=True))
    out_tr_f32 = out_tr.astype(jnp.float32)
    ok = (out_tr_f32 == 0.0) | (jnp.abs(out_tr_f32 - ref_tr) < 1e-5)
    assert bool(jnp.all(ok)), "dropout values are not {0, ref/keep}"
    assert int(jnp.sum(out_tr_f32 == 0.0)) > int(jnp.sum(ref_tr == 0.0)), \
        "dropout did not drop anything"

    print("KERNEL_OK")
</pallas_src>

<mosaic_0001>
module attributes {stable_mosaic.version = 11 : i64} {
  func.func @kernel(%arg0: i32, %arg1: memref<8x4xi32, #tpu.memory_space<vmem>>, %arg2: memref<4x128x128xbf16, #tpu.memory_space<vmem>>, %arg3: memref<8x128xbf16, #tpu.memory_space<vmem>>) attributes {dimension_semantics = [#tpu.dimension_semantics<parallel>], iteration_bounds = array<i64: 1>, scalar_prefetch = 0 : i64, scratch_operands = 0 : i64, tpu.core_type = #tpu.core_type<tc>, window_params = [{transform_indices = @transform_0, window_bounds = array<i64: 8, 4>}, {pipeline_mode = #tpu.pipeline_mode<synchronous>, transform_indices = @transform_1, window_bounds = array<i64: 4, 128, 128>}, {transform_indices = @transform_2, window_bounds = array<i64: 8, 128>}]} {
    %c0 = arith.constant 0 : index
    %c0_0 = arith.constant 0 : index
    %0 = vector.load %arg1[%c0, %c0_0] : memref<8x4xi32, #tpu.memory_space<vmem>>, vector<8x4xi32>
    %1 = tpu.iota {dimensions = array<i32: 1>} : vector<8x128xi32>
    %2 = vector.extract_strided_slice %0 {offsets = [0, 0], sizes = [8, 1], strides = [1, 1]} : vector<8x4xi32> to vector<8x1xi32>
    %3 = vector.broadcast %2 : vector<8x1xi32> to vector<8x128xi32>
    %4 = arith.cmpi eq, %1, %3 : vector<8x128xi32>
    %5 = arith.extui %4 : vector<8x128xi1> to vector<8x128xi32>
    %6 = arith.sitofp %5 : vector<8x128xi32> to vector<8x128xf32>
    %7 = arith.truncf %6 : vector<8x128xf32> to vector<8x128xbf16>
    %c0_1 = arith.constant 0 : index
    %c0_2 = arith.constant 0 : index
    %c0_3 = arith.constant 0 : index
    %8 = vector.load %arg2[%c0_1, %c0_2, %c0_3] : memref<4x128x128xbf16, #tpu.memory_space<vmem>>, vector<1x128x128xbf16>
    %9 = vector.shape_cast %8 : vector<1x128x128xbf16> to vector<128x128xbf16>
    %cst = arith.constant dense<0.000000e+00> : vector<8x128xf32>
    %10 = tpu.matmul %7, %9, %cst {dimension_numbers = #tpu.dot_dimension_numbers<[1], [0], [0], [1], [0, 0, 1, 1], [], []>} : vector<8x128xbf16>, vector<128x128xbf16>, vector<8x128xf32> -> vector<8x128xf32>
    %11 = vector.extract_strided_slice %0 {offsets = [0, 1], sizes = [8, 1], strides = [1, 1]} : vector<8x4xi32> to vector<8x1xi32>
    %12 = vector.broadcast %11 : vector<8x1xi32> to vector<8x128xi32>
    %13 = arith.cmpi eq, %1, %12 : vector<8x128xi32>
    %14 = arith.extui %13 : vector<8x128xi1> to vector<8x128xi32>
    %15 = arith.sitofp %14 : vector<8x128xi32> to vector<8x128xf32>
    %16 = arith.truncf %15 : vector<8x128xf32> to vector<8x128xbf16>
    %c1 = arith.constant 1 : index
    %c0_4 = arith.constant 0 : index
    %c0_5 = arith.constant 0 : index
    %17 = vector.load %arg2[%c1, %c0_4, %c0_5] : memref<4x128x128xbf16, #tpu.memory_space<vmem>>, vector<1x128x128xbf16>
    %18 = vector.shape_cast %17 : vector<1x128x128xbf16> to vector<128x128xbf16>
    %cst_6 = arith.constant dense<0.000000e+00> : vector<8x128xf32>
    %19 = tpu.matmul %16, %18, %cst_6 {dimension_numbers = #tpu.dot_dimension_numbers<[1], [0], [0], [1], [0, 0, 1, 1], [], []>} : vector<8x128xbf16>, vector<128x128xbf16>, vector<8x128xf32> -> vector<8x128xf32>
    %20 = arith.addf %10, %19 : vector<8x128xf32>
    %21 = vector.extract_strided_slice %0 {offsets = [0, 2], sizes = [8, 1], strides = [1, 1]} : vector<8x4xi32> to vector<8x1xi32>
    %22 = vector.broadcast %21 : vector<8x1xi32> to vector<8x128xi32>
    %23 = arith.cmpi eq, %1, %22 : vector<8x128xi32>
    %24 = arith.extui %23 : vector<8x128xi1> to vector<8x128xi32>
    %25 = arith.sitofp %24 : vector<8x128xi32> to vector<8x128xf32>
    %26 = arith.truncf %25 : vector<8x128xf32> to vector<8x128xbf16>
    %c2 = arith.constant 2 : index
    %c0_7 = arith.constant 0 : index
    %c0_8 = arith.constant 0 : index
    %27 = vector.load %arg2[%c2, %c0_7, %c0_8] : memref<4x128x128xbf16, #tpu.memory_space<vmem>>, vector<1x128x128xbf16>
    %28 = vector.shape_cast %27 : vector<1x128x128xbf16> to vector<128x128xbf16>
    %cst_9 = arith.constant dense<0.000000e+00> : vector<8x128xf32>
    %29 = tpu.matmul %26, %28, %cst_9 {dimension_numbers = #tpu.dot_dimension_numbers<[1], [0], [0], [1], [0, 0, 1, 1], [], []>} : vector<8x128xbf16>, vector<128x128xbf16>, vector<8x128xf32> -> vector<8x128xf32>
    %30 = arith.addf %20, %29 : vector<8x128xf32>
    %31 = vector.extract_strided_slice %0 {offsets = [0, 3], sizes = [8, 1], strides = [1, 1]} : vector<8x4xi32> to vector<8x1xi32>
    %32 = vector.broadcast %31 : vector<8x1xi32> to vector<8x128xi32>
    %33 = arith.cmpi eq, %1, %32 : vector<8x128xi32>
    %34 = arith.extui %33 : vector<8x128xi1> to vector<8x128xi32>
    %35 = arith.sitofp %34 : vector<8x128xi32> to vector<8x128xf32>
    %36 = arith.truncf %35 : vector<8x128xf32> to vector<8x128xbf16>
    %c3 = arith.constant 3 : index
    %c0_10 = arith.constant 0 : index
    %c0_11 = arith.constant 0 : index
    %37 = vector.load %arg2[%c3, %c0_10, %c0_11] : memref<4x128x128xbf16, #tpu.memory_space<vmem>>, vector<1x128x128xbf16>
    %38 = vector.shape_cast %37 : vector<1x128x128xbf16> to vector<128x128xbf16>
    %cst_12 = arith.constant dense<0.000000e+00> : vector<8x128xf32>
    %39 = tpu.matmul %36, %38, %cst_12 {dimension_numbers = #tpu.dot_dimension_numbers<[1], [0], [0], [1], [0, 0, 1, 1], [], []>} : vector<8x128xbf16>, vector<128x128xbf16>, vector<8x128xf32> -> vector<8x128xf32>
    %40 = arith.addf %30, %39 : vector<8x128xf32>
    %cst_13 = arith.constant 0.000000e+00 : f32
    %41 = vector.broadcast %cst_13 : f32 to vector<8x128xf32>
    %42 = arith.maximumf %40, %41 : vector<8x128xf32>
    %43 = arith.truncf %42 : vector<8x128xf32> to vector<8x128xbf16>
    %c0_14 = arith.constant 0 : index
    %c0_15 = arith.constant 0 : index
    %44 = vector.load %arg3[%c0_14, %c0_15] : memref<8x128xbf16, #tpu.memory_space<vmem>>, vector<8x128xbf16>
    tpu.vector_store %arg3[%c0_14, %c0_15], %43 {strides = array<i32>} : memref<8x128xbf16, #tpu.memory_space<vmem>>, vector<8x128xbf16>,
    return
  }
  func.func @transform_0(%arg0: i32) -> (i32, i32) {
    %c0_i32 = arith.constant 0 : i32
    %c0_i32_0 = arith.constant 0 : i32
    return %arg0, %c0_i32 : i32, i32
  }
  func.func @transform_1(%arg0: i32) -> (i32, i32, i32) {
    %c0_i32 = arith.constant 0 : i32
    %c0_i32_0 = arith.constant 0 : i32
    %c0_i32_1 = arith.constant 0 : i32
    %c0_i32_2 = arith.constant 0 : i32
    return %c0_i32, %c0_i32_0, %c0_i32_1 : i32, i32, i32
  }
  func.func @transform_2(%arg0: i32) -> (i32, i32) {
    %c0_i32 = arith.constant 0 : i32
    %c0_i32_0 = arith.constant 0 : i32
    return %arg0, %c0_i32 : i32, i32
  }
}

</mosaic_0001>

<bundles_post_ra>
// kernel: category_encoder_forward.1
= control target key start
LH: loop header
LB: loop body
LE: loop exit
PB: predicated region body
PF: predicated region fallthrough
CT: control target
= control target key end

     0   :  { %7 = vsyncpa [#allocation3], 0  ;;  %s589_s12 = smov [#allocation2]   ;;  %s590_s14 = smov 64   ;;  %s621_s0 = inlined_call_operand.vmem [shape: s32[8,4], index: 0, kind: input, shape index: {}]   ;;  %s622_s1 = inlined_call_operand.hbm [shape: bf16[4,128,128], index: 1, kind: input, shape index: {}]   ;;  %s623_s2 = inlined_call_operand.vmem [shape: bf16[8,128], index: 2, kind: output, shape index: {}]  }
   0x1   :  { %s14_s11 = sshll.u32 %s622_s1, 4  ;;  %s16_s13 = sshll.u32 %s589_s12, 4  ;;  %s15_s11 = int_to_ptr.hbm [resolvable:$true] %s14_s11  ;;  %s17_s13 = int_to_ptr.vmem [resolvable:$true] %s16_s13 }
   0x2   :  { %s591_s15 = smov 4  }
   0x3   :  { %22 = dma.hbm_to_vmem [thread:$0]  %s15_s11, 4096, %s17_s13, [#allocation3], %s590_s14, %s590_s14, %s591_s15  }
   0x4   :  { %587 = dma.done.wait [#allocation3], 4096  }
   0x5   :  { %588 = vsyncadd [#allocation3], 4294963200  ;;  %v592_v0 = vmov 2   ;;  %v593_v1 = vmov 0   ;;  %v27_v2 = vld [vmem:[%s621_s0] sm:$0xff]  ;;  %v526_v3 = vld [vmem:[#allocation2 + $0x38] sm:$0xff]  ;;  %v28_v37 = vlaneseq }
   0x6   :  { %559 = vset.pattern.permute.xlu0 %v592_v0  ;;  %561 = vset.pattern.permute.xlu1 %v593_v1  ;;  %v542_v4 = vld [vmem:[#allocation2 + $0xb8] sm:$0xff]  ;;  %v525_v5 = vld [vmem:[#allocation2 + $0x30] sm:$0xff]  ;;  %v524_v11 = vld [vmem:[#allocation2 + $0x28] sm:$0xff]  ;;  %v594_v15 = vmov 1   ;;  %v595_v16 = vmov 3  }
   0x7   :  { %31 = vperm.xlu1 %561, %v27_v2   ;;  %200 = vperm.xlu0 %559, %v27_v2   ;;  %v541_v6 = vld [vmem:[#allocation2 + $0xb0] sm:$0xff]  ;;  %v534_v7 = vld [vmem:[#allocation2 + $0x78] sm:$0xff]  ;;  %v540_v12 = vld [vmem:[#allocation2 + $0xa8] sm:$0xff]  ;;  %v29_v38 = vand.u32 127, %v28_v37  ;;  %v596_v41 = vmov 1.0|1.0  }
   0x8   :  { %186 = vmatpush.bf16.msra.mxu1 %v526_v3  ;;  %271 = vmatpush.bf16.msra.mxu2 %v542_v4  ;;  %v550_v8 = vld [vmem:[#allocation2 + $0xf8] sm:$0xff]  ;;  %v533_v9 = vld [vmem:[#allocation2 + $0x70] sm:$0xff]  ;;  %v532_v13 = vld [vmem:[#allocation2 + $0x68] sm:$0xff] }
   0x9   :  { %125 = vmatpush.bf16.msra.mxu0 %v534_v7  ;;  %357 = vmatpush.bf16.msra.mxu3 %v550_v8  ;;  %v549_v10 = vld [vmem:[#allocation2 + $0xf0] sm:$0xff]  ;;  %v548_v14 = vld [vmem:[#allocation2 + $0xe8] sm:$0xff]  ;;  %v523_v17 = vld [vmem:[#allocation2 + $0x20] sm:$0xff] }
   0xa   :  { %v539_v18 = vld [vmem:[#allocation2 + $0xa0] sm:$0xff]  ;;  %v522_v21 = vld [vmem:[#allocation2 + $0x18] sm:$0xff]  ;;  %v521_v25 = vld [vmem:[#allocation2 + $0x10] sm:$0xff] }
   0xb   :  { %v531_v19 = vld [vmem:[#allocation2 + $0x60] sm:$0xff]  ;;  %v538_v22 = vld [vmem:[#allocation2 + $0x98] sm:$0xff]  ;;  %v537_v26 = vld [vmem:[#allocation2 + $0x90] sm:$0xff] }
   0xc   :  { %187 = vmatpush.bf16.msra.mxu1 %v525_v5  ;;  %272 = vmatpush.bf16.msra.mxu2 %v541_v6  ;;  %v547_v20 = vld [vmem:[#allocation2 + $0xe0] sm:$0xff]  ;;  %v530_v23 = vld [vmem:[#allocation2 + $0x58] sm:$0xff]  ;;  %v520_v27 = vld [vmem:[#allocation2 + $0x8] sm:$0xff] }
   0xd   :  { %126 = vmatpush.bf16.msra.mxu0 %v533_v9  ;;  %358 = vmatpush.bf16.msra.mxu3 %v549_v10  ;;  %v546_v24 = vld [vmem:[#allocation2 + $0xd8] sm:$0xff]  ;;  %v536_v28 = vld [vmem:[#allocation2 + $0x88] sm:$0xff]  ;;  %v519_v29 = vld [vmem:[#allocation2] sm:$0xff] }
   0xe   :  { %v535_v30 = vld [vmem:[#allocation2 + $0x80] sm:$0xff]  ;;  %v529_v31 = vld [vmem:[#allocation2 + $0x50] sm:$0xff]  ;;  %v528_v33 = vld [vmem:[#allocation2 + $0x48] sm:$0xff] }
   0xf   :  { %562 = vset.pattern.permute.xlu1 %v594_v15  ;;  %560 = vset.pattern.permute.xlu0 %v595_v16  ;;  %v545_v32 = vld [vmem:[#allocation2 + $0xd0] sm:$0xff]  ;;  %v544_v34 = vld [vmem:[#allocation2 + $0xc8] sm:$0xff]  ;;  %v527_v35 = vld [vmem:[#allocation2 + $0x40] sm:$0xff] }
  0x10   :  { %54 = vperm.xlu1 %562, %v27_v2   ;;  %286 = vperm.xlu0 %560, %v27_v2   ;;  %v543_v36 = vld [vmem:[#allocation2 + $0xc0] sm:$0xff] }
  0x11   :  { %188 = vmatpush.bf16.msra.mxu1 %v524_v11  ;;  %273 = vmatpush.bf16.msra.mxu2 %v540_v12 }
  0x12   :  { %127 = vmatpush.bf16.msra.mxu0 %v532_v13  ;;  %359 = vmatpush.bf16.msra.mxu3 %v548_v14 }
  0x15   :  { %189 = vmatpush.bf16.msra.mxu1 %v523_v17  ;;  %274 = vmatpush.bf16.msra.mxu2 %v539_v18 }
  0x16   :  { %128 = vmatpush.bf16.msra.mxu0 %v531_v19  ;;  %360 = vmatpush.bf16.msra.mxu3 %v547_v20 }
  0x19   :  { %190 = vmatpush.bf16.msra.mxu1 %v522_v21  ;;  %275 = vmatpush.bf16.msra.mxu2 %v538_v22 }
  0x1a   :  { %129 = vmatpush.bf16.msra.mxu0 %v530_v23  ;;  %361 = vmatpush.bf16.msra.mxu3 %v546_v24 }
  0x1d   :  { %191 = vmatpush.bf16.msra.mxu1 %v521_v25  ;;  %276 = vmatpush.bf16.msra.mxu2 %v537_v26 }
  0x1e   :  { %130 = vmatpush.bf16.msra.mxu0 %v529_v31  ;;  %362 = vmatpush.bf16.msra.mxu3 %v545_v32 }
  0x21   :  { %192 = vmatpush.bf16.msra.mxu1 %v520_v27  ;;  %277 = vmatpush.bf16.msra.mxu2 %v536_v28 }
  0x22   :  { %131 = vmatpush.bf16.msra.mxu0 %v528_v33  ;;  %363 = vmatpush.bf16.msra.mxu3 %v544_v34 }
  0x25   :  { %193 = vmatpush.bf16.msra.mxu1 %v519_v29  ;;  %278 = vmatpush.bf16.msra.mxu2 %v535_v30 }
  0x26   :  { %132 = vmatpush.bf16.msra.mxu0 %v527_v35  ;;  %364 = vmatpush.bf16.msra.mxu3 %v543_v36 }
  0x79   :  { %v32_v39 = vpop.permute.xlu1 %31  ;;  %v201_v40 = vpop.permute.xlu0 %200 }
  0x7a   :  { %vm33_vm0 = vcmp.eq.s32.totalorder %v29_v38, %v32_v39  ;;  %vm202_vm1 = vcmp.eq.s32.totalorder %v29_v38, %v201_v40 }
  0x7b   :  { %vm447_vm2 = vmpackc.low %vm33_vm0, %vm33_vm0 }
  0x7c   :  { %vm482_vm3 = vmpackc.low %vm202_vm1, %vm202_vm1  ;;  %448 = vmatmul.msk.bf16.vlgmr.msra.gmra.mxu1 %vm447_vm2, %v596_v41 }
  0x7d   :  { %483 = vmatmul.msk.bf16.vlgmr.msra.gmra.mxu2 %vm482_vm3, %v596_v41 }
  0x82   :  { %v55_v42 = vpop.permute.xlu1 %54  ;;  %v287_v43 = vpop.permute.xlu0 %286 }
  0x83   :  { %vm56_vm4 = vcmp.eq.s32.totalorder %v29_v38, %v55_v42  ;;  %vm288_vm5 = vcmp.eq.s32.totalorder %v29_v38, %v287_v43 }
  0x84   :  { %vm413_vm6 = vmpackc.low %vm56_vm4, %vm56_vm4 }
  0x85   :  { %vm517_vm7 = vmpackc.low %vm288_vm5, %vm288_vm5  ;;  %414 = vmatmul.msk.bf16.vlgmr.msra.gmra.mxu0 %vm413_vm6, %v596_v41 }
  0x86   :  { %518 = vmatmul.msk.bf16.vlgmr.msra.gmra.mxu3 %vm517_vm7, %v596_v41 }
  0xf9   :  { %v195_v44 = vpop.f32.mrf.mxu1 }
 0x100   :  { %v280_v45 = vpop.f32.mrf.mxu2 }
 0x101   :  { %v197_v46 = vpop.f32.mrf.mxu1 }
 0x102   :  { %v134_v47 = vpop.f32.mrf.mxu0 }
 0x103   :  { %v196_v48 = vadd.f32 %v195_v44, %v134_v47 }
 0x105   :  { %v284_v50 = vadd.f32 %v280_v45, %v196_v48 }
 0x108   :  { %v282_v49 = vpop.f32.mrf.mxu2 }
 0x109   :  { %v366_v51 = vpop.f32.mrf.mxu3 }
 0x10a   :  { %v370_v52 = vadd.f32 %v366_v51, %v284_v50  ;;  %v136_v53 = vpop.f32.mrf.mxu0 }
 0x10c   :  { %v371_v54 = vmax.f32 %v370_v52, 0.0 }
 0x10e   :  { %v372_v55 = vpack.c.bf16 %v371_v54, %v371_v54 }
 0x110   :  { %373 = vst [vmem:[%s623_s2] sm:$0xf] %v372_v55 }
 0x111   :  { %v368_v56 = vpop.f32.mrf.mxu3 }
 0x112   :  { %378 = vsyncpa [#allocation3], 1 }

</bundles_post_ra>
